<compile_context>
chip_gen: v7x
topology: tpu7x:2x2x1
jax: 0.10.0
libtpu: 0.0.40
codegen_flags: <defaults>
</compile_context>

<pallas_src>
import math

import jax
import jax.numpy as jnp
from jax.experimental import pallas as pl
from jax.experimental.pallas import tpu as pltpu

_HALF_LOG_2PI = 0.5 * math.log(2.0 * math.pi)


def _normal_logprob_kernel(x_ref, v_ref, w_ref, const_ref, out_ref):
    # x_ref, v_ref: (tile_b, lane) streamed blocks, lane = fold_g * D.
    # w_ref:        (lane, fold_g) block-diagonal matrix of -0.5*exp(-2*stds).
    # const_ref:    (1, 1) SMEM scalar: -sum(stds) - 0.5*D*log(2*pi).
    diff = v_ref[...].astype(jnp.float32) - x_ref[...].astype(jnp.float32)
    sq = diff * diff                                        # VALU: sub + mul only
    # Segmented sum over each D-lane group on the otherwise-idle MXU
    # (f32 x f32, HIGHEST precision keeps full f32 accuracy).
    ss = jnp.dot(sq, w_ref[...],
                 preferred_element_type=jnp.float32,
                 precision=jax.lax.Precision.HIGHEST)       # (tile_b, fold_g)
    out_ref[...] = ss + const_ref[0, 0]


def _round_up(a, m):
    return -(-a // m) * m


def _vmem_budget():
    """(per-input target block bytes, vmem_limit_bytes) for this generation."""
    cap = None
    try:
        cap = getattr(pltpu.get_tpu_info(), "vmem_capacity_bytes", None)
    except Exception:
        cap = None
    if cap is None:
        cap = 64 << 20                       # conservative (v7x-sized) fallback
    if cap >= (96 << 20):                    # v5e / v6e: 128 MiB physical VMEM
        return 8 << 20, 96 << 20
    return 5 << 20, 44 << 20                 # v7x: 64 MiB physical VMEM


def _pick_tile_b(n_rows, lane_w, itemsize, row_mult, target_block_bytes):
    """Batch tile: multiple of row_mult, ~target bytes of *padded* VMEM/input."""
    row_bytes = max(lane_w * itemsize, 1)
    tb = max(row_mult, (target_block_bytes // row_bytes) // row_mult * row_mult)
    # >= 4 grid steps when the batch allows it: >= 2 steps per TensorCore after
    # the v7x megacore split, so each core's HBM->VMEM pipeline double-buffers.
    if n_rows >= 4 * row_mult:
        quarter = _round_up(_round_up(n_rows, 4) // 4, row_mult)
        tb = min(tb, quarter)
    return max(row_mult, min(tb, _round_up(n_rows, row_mult)))


def _coerce(a):
    a = jnp.asarray(a)
    if a.dtype not in (jnp.float32, jnp.bfloat16):
        a = a.astype(jnp.float32)
    return a


def normal_log_prob(value, loc, stds, *, tile_b=None):
    """Summed-over-last-axis diagonal Gaussian log-prob via a Pallas kernel.

    value, loc: [..., D] float32 or bfloat16 (mixed dtypes allowed).
    stds:       [D] float32 log standard deviations.
    Returns:    [...] float32 (last axis reduced away).
    """
    loc = _coerce(loc)
    value = _coerce(value)
    stds = jnp.asarray(stds, jnp.float32).reshape(-1)

    lead_shape = loc.shape[:-1]
    D = loc.shape[-1]
    assert value.shape == loc.shape, (value.shape, loc.shape)
    assert stds.shape[0] == D

    loc2 = loc.reshape(-1, D)
    val2 = value.reshape(-1, D)
    B = loc2.shape[0]

    # Fold g batch rows into the 128-lane axis when D is a small divisor of
    # 128: full lane utilization, no lane padding, g-lane-dense output.
    g = 128 // D if (D < 128 and 128 % D == 0) else 1
    B_pad = _round_up(B, g)
    if B_pad != B:
        pad = B_pad - B
        loc2 = jnp.pad(loc2, ((0, pad), (0, 0)))
        val2 = jnp.pad(val2, ((0, pad), (0, 0)))
    n_rows = B_pad // g
    lane = g * D
    loc2 = loc2.reshape(n_rows, lane)
    val2 = val2.reshape(n_rows, lane)

    lane_w = _round_up(lane, 128)            # padded lane width actually in VMEM
    itemsize = max(jnp.dtype(loc2.dtype).itemsize, jnp.dtype(val2.dtype).itemsize)
    row_mult = 16 if (loc2.dtype == jnp.bfloat16 or val2.dtype == jnp.bfloat16) else 8

    target_block_bytes, vmem_limit = _vmem_budget()
    # Hard cap so 2 inputs x 2 pipeline buffers (+ slack) fit the vmem limit,
    # using the padded lane width (correct even for tiny D).
    max_tb = max(row_mult,
                 ((vmem_limit // 5) // (lane_w * itemsize)) // row_mult * row_mult)
    if tile_b is None:
        tile_b = _pick_tile_b(n_rows, lane_w, itemsize, row_mult, target_block_bytes)
    else:
        tile_b = max(row_mult, (int(tile_b) // row_mult) * row_mult)
    tile_b = min(tile_b, max_tb)

    # Hoisted, D-sized constants (computed once in the wrapper, not per step).
    neg_half_inv_var = -0.5 * jnp.exp(-2.0 * stds)                    # (D,)
    w = (jnp.eye(g, dtype=jnp.float32)[:, None, :]
         * neg_half_inv_var[None, :, None]).reshape(lane, g)          # block-diag
    row_const = jnp.reshape(-jnp.sum(stds) - D * _HALF_LOG_2PI, (1, 1))

    grid = (pl.cdiv(n_rows, tile_b),)

    out = pl.pallas_call(
        _normal_logprob_kernel,
        out_shape=jax.ShapeDtypeStruct((n_rows, g), jnp.float32),
        grid_spec=pltpu.PrefetchScalarGridSpec(
            num_scalar_prefetch=0,
            grid=grid,
            in_specs=[
                pl.BlockSpec((tile_b, lane), lambda i: (i, 0)),       # loc
                pl.BlockSpec((tile_b, lane), lambda i: (i, 0)),       # value
                pl.BlockSpec((lane, g), lambda i: (0, 0)),            # W (resident)
                pl.BlockSpec(memory_space=pltpu.MemorySpace.SMEM),    # row constant
            ],
            out_specs=pl.BlockSpec((tile_b, g), lambda i: (i, 0)),
        ),
        compiler_params=pltpu.CompilerParams(
            dimension_semantics=("parallel",),
            vmem_limit_bytes=vmem_limit,
        ),
    )(loc2, val2, w, row_const)
    return out.reshape(B_pad)[:B].reshape(lead_shape)


class NormalDist:
    """JAX analogue of the distribution returned by Normal.forward(x)."""

    def __init__(self, loc, log_stds):
        self.loc = jnp.asarray(loc)
        self.log_stds = jnp.asarray(log_stds, jnp.float32)
        self.scale = jnp.exp(self.log_stds)

    def log_prob(self, value):
        # Matches torch.distributions.Normal(...).log_prob(value).sum(-1)
        return normal_log_prob(value, self.loc, self.log_stds)

    def mean(self):
        return self.loc

    def sample(self, key):
        # TODO(synk): sampling is plain JAX (jax.random), not a Pallas kernel.
        eps = jax.random.normal(key, self.loc.shape, dtype=jnp.float32)
        return self.loc.astype(jnp.float32) + eps * self.scale


class Normal:
    """Pallas-backed port of the PyTorch `Normal` module."""

    def __init__(self, num_outputs):
        # Same init as nn.Parameter(torch.zeros(num_outputs)).
        self.stds = jnp.zeros((num_outputs,), dtype=jnp.float32)

    def __call__(self, x):
        return NormalDist(loc=x, log_stds=self.stds)


def _reference_log_prob(value, loc, stds):
    scale = jnp.exp(stds)
    lp = (-0.5 * ((value.astype(jnp.float32) - loc.astype(jnp.float32)) / scale) ** 2
          - jnp.log(scale) - _HALF_LOG_2PI)
    return jnp.sum(lp, axis=-1)


if __name__ == "__main__":
    key = jax.random.PRNGKey(0)
    k_s, k_x, k_v, k_x2, k_v2, k_x3, k_v3 = jax.random.split(key, 7)

    num_outputs = 32
    module = Normal(num_outputs)
    # Non-trivial deterministic learned log-stds.
    module.stds = 0.1 * jax.random.normal(k_s, (num_outputs,), dtype=jnp.float32)

    # --- module-sized case; B=10 exercises the batch-fold padding path ---
    batch = 10
    x = jax.random.normal(k_x, (batch, num_outputs), dtype=jnp.float32)
    v = jax.random.normal(k_v, (batch, num_outputs), dtype=jnp.float32)
    dist = module(x)
    lp = jax.block_until_ready(dist.log_prob(v))
    ref = _reference_log_prob(v, x, module.stds)
    assert lp.shape == (batch,)
    assert jnp.allclose(lp, ref, atol=1e-4, rtol=1e-4), (lp, ref)

    # --- multi-step grid with a partial last tile (cdiv tiling + fold) ---
    b2 = 300
    x2 = jax.random.normal(k_x2, (b2, num_outputs), dtype=jnp.float32)
    v2 = jax.random.normal(k_v2, (b2, num_outputs), dtype=jnp.float32)
    lp2 = jax.block_until_ready(normal_log_prob(v2, x2, module.stds, tile_b=64))
    ref2 = _reference_log_prob(v2, x2, module.stds)
    assert lp2.shape == (b2,)
    assert jnp.allclose(lp2, ref2, atol=1e-4, rtol=1e-4), (lp2, ref2)

    # --- bf16 streaming inputs (halves HBM traffic), f32 accumulation ---
    x2b = x2.astype(jnp.bfloat16)
    v2b = v2.astype(jnp.bfloat16)
    lp3 = jax.block_until_ready(normal_log_prob(v2b, x2b, module.stds))
    ref3 = _reference_log_prob(v2b, x2b, module.stds)
    assert jnp.allclose(lp3, ref3, atol=1e-3, rtol=1e-3), (lp3, ref3)

    # --- D that does not divide 128 exercises the unfolded (g=1) path,
    #     with extra leading dims to exercise the wrapper reshape ---
    d3 = 48
    stds3 = 0.05 * jax.random.normal(k_s, (d3,), dtype=jnp.float32)
    x3 = jax.random.normal(k_x3, (2, 4, d3), dtype=jnp.float32)
    v3 = jax.random.normal(k_v3, (2, 4, d3), dtype=jnp.float32)
    lp4 = jax.block_until_ready(normal_log_prob(v3, x3, stds3))
    ref4 = _reference_log_prob(v3, x3, stds3)
    assert lp4.shape == (2, 4)
    assert jnp.allclose(lp4, ref4, atol=1e-4, rtol=1e-4), (lp4, ref4)

    print("KERNEL_OK")
</pallas_src>

<mosaic_0001>
module attributes {stable_mosaic.version = 11 : i64} {
  func.func @_normal_logprob_kernel(%arg0: i32, %arg1: memref<8x128xf32, #tpu.memory_space<vmem>>, %arg2: memref<8x128xf32, #tpu.memory_space<vmem>>, %arg3: memref<128x4xf32, #tpu.memory_space<vmem>>, %arg4: memref<1x1xf32, #tpu.memory_space<smem>>, %arg5: memref<8x4xf32, #tpu.memory_space<vmem>>) attributes {dimension_semantics = [#tpu.dimension_semantics<parallel>], iteration_bounds = array<i64: 1>, scalar_prefetch = 0 : i64, scratch_operands = 0 : i64, tpu.core_type = #tpu.core_type<tc>, window_params = [{transform_indices = @transform_0, window_bounds = array<i64: 8, 128>}, {transform_indices = @transform_1, window_bounds = array<i64: 8, 128>}, {pipeline_mode = #tpu.pipeline_mode<synchronous>, transform_indices = @transform_2, window_bounds = array<i64: 128, 4>}, {transform_indices = @transform_3, window_bounds = array<i64: 1, 1>}, {transform_indices = @transform_4, window_bounds = array<i64: 8, 4>}]} {
    %c0 = arith.constant 0 : index
    %c0_0 = arith.constant 0 : index
    %0 = vector.load %arg2[%c0, %c0_0] : memref<8x128xf32, #tpu.memory_space<vmem>>, vector<8x128xf32>
    %c0_1 = arith.constant 0 : index
    %c0_2 = arith.constant 0 : index
    %1 = vector.load %arg1[%c0_1, %c0_2] : memref<8x128xf32, #tpu.memory_space<vmem>>, vector<8x128xf32>
    %2 = arith.subf %0, %1 : vector<8x128xf32>
    %3 = arith.mulf %2, %2 : vector<8x128xf32>
    %c0_3 = arith.constant 0 : index
    %c0_4 = arith.constant 0 : index
    %4 = vector.load %arg3[%c0_3, %c0_4] : memref<128x4xf32, #tpu.memory_space<vmem>>, vector<128x4xf32>
    %cst = arith.constant dense<0.000000e+00> : vector<8x4xf32>
    %5 = tpu.matmul %3, %4, %cst {dimension_numbers = #tpu.dot_dimension_numbers<[1], [0], [0], [1], [0, 0, 1, 1], [], []>, precision = #tpu.contract_precision<fp32>} : vector<8x128xf32>, vector<128x4xf32>, vector<8x4xf32> -> vector<8x4xf32>
    %c0_5 = arith.constant 0 : index
    %c0_6 = arith.constant 0 : index
    %6 = memref.load %arg4[%c0_5, %c0_6] : memref<1x1xf32, #tpu.memory_space<smem>>
    %7 = vector.broadcast %6 : f32 to vector<8x4xf32>
    %8 = arith.addf %5, %7 : vector<8x4xf32>
    %c0_7 = arith.constant 0 : index
    %c0_8 = arith.constant 0 : index
    %9 = vector.load %arg5[%c0_7, %c0_8] : memref<8x4xf32, #tpu.memory_space<vmem>>, vector<8x4xf32>
    tpu.vector_store %arg5[%c0_7, %c0_8], %8 {strides = array<i32>} : memref<8x4xf32, #tpu.memory_space<vmem>>, vector<8x4xf32>,
    return
  }
  func.func @transform_0(%arg0: i32) -> (i32, i32) {
    %c0_i32 = arith.constant 0 : i32
    %c0_i32_0 = arith.constant 0 : i32
    return %arg0, %c0_i32 : i32, i32
  }
  func.func @transform_1(%arg0: i32) -> (i32, i32) {
    %c0_i32 = arith.constant 0 : i32
    %c0_i32_0 = arith.constant 0 : i32
    return %arg0, %c0_i32 : i32, i32
  }
  func.func @transform_2(%arg0: i32) -> (i32, i32) {
    %c0_i32 = arith.constant 0 : i32
    %c0_i32_0 = arith.constant 0 : i32
    %c0_i32_1 = arith.constant 0 : i32
    return %c0_i32, %c0_i32_0 : i32, i32
  }
  func.func @transform_3(%arg0: i32) -> (i32, i32) {
    %c0_i32 = arith.constant 0 : i32
    %c0_i32_0 = arith.constant 0 : i32
    %c0_i32_1 = arith.constant 0 : i32
    return %c0_i32, %c0_i32_0 : i32, i32
  }
  func.func @transform_4(%arg0: i32) -> (i32, i32) {
    %c0_i32 = arith.constant 0 : i32
    %c0_i32_0 = arith.constant 0 : i32
    return %arg0, %c0_i32 : i32, i32
  }
}

</mosaic_0001>

<bundles_post_ra>
// kernel: tpu_custom_call.1
= control target key start
LH: loop header
LB: loop body
LE: loop exit
PB: predicated region body
PF: predicated region fallthrough
CT: control target
= control target key end

     0   :  { %10 = vsyncpa [#allocation4], 0  ;;  %v1196_v2 = vmov 0.0|0.0   ;;  %vm1197_vm0 = vmmov 0   ;;  %v1198_v11 = vmov 0.0   ;;  %vm682_vm1 = vcmask 31744   ;;  %s1559_s0 = inlined_call_operand.vmem [shape: f32[3,128], index: 0, kind: input, shape index: {}]   ;;  %s1560_s1 = inlined_call_operand.vmem [shape: f32[3,128], index: 1, kind: input, shape index: {}]   ;;  %s1561_s2 = inlined_call_operand.vmem [shape: f32[128,4], index: 2, kind: input, shape index: {}]   ;;  %s1562_s3 = inlined_call_operand.<no memory space> [shape: f32[1,1], index: 3, kind: input, shape index: {}]   ;;  %s1563_s4 = inlined_call_operand.hbm [shape: f32[3,4], index: 4, kind: output, shape index: {}]  }
   0x1   :  { %v23_v0 = vld [vmem:[%s1561_s2] sm:$0xff]  ;;  %v24_v1 = vld [vmem:[%s1561_s2 + $0x8] sm:$0xff]  ;;  %1012 = vmatprep.subr.bf16.mxu1 %v1196_v2  ;;  %1084 = vmatprep.subr.bf16.mxu0 %v1196_v2  ;;  %v25_v5 = vld [vmem:[%s1561_s2 + $0x10] sm:$0xff] }
   0x2   :  { %v42_v3 = vand.u32 4294901760, %v23_v0  ;;  %v45_v4 = vand.u32 4294901760, %v24_v1  ;;  %v26_v6 = vld [vmem:[%s1561_s2 + $0x18] sm:$0xff]  ;;  %v48_v7 = vand.u32 4294901760, %v25_v5  ;;  %v1244_v9 = vld [vmem:[%s1561_s2 + $0x20] sm:$0xff]  ;;  %v1249_v10 = vld [vmem:[%s1561_s2 + $0x28] sm:$0xff]  ;;  %834 = vmatprep.mubr.msk.f32.mxu1 %vm1197_vm0, %v1198_v11  ;;  %939 = vmatprep.mubr.msk.f32.mxu0 %vm1197_vm0, %v1198_v11 }
   0x3   :  { %v51_v8 = vand.u32 4294901760, %v26_v6  ;;  %v54_v14 = vand.u32 4294901760, %v1244_v9  ;;  %v57_v15 = vand.u32 4294901760, %v1249_v10  ;;  %v1268_v16 = vld [vmem:[%s1561_s2 + $0x30] sm:$0xff]  ;;  %v1273_v17 = vld [vmem:[%s1561_s2 + $0x38] sm:$0xff]  ;;  %v19_v18 = vld [vmem:[%s1560_s1] sm:$0xff] }
   0x4   :  { %v1255_v12 = vpack.c.bf16 %v45_v4, %v42_v3  ;;  %v20_v19 = vld [vmem:[%s1559_s0] sm:$0xff]  ;;  %v60_v21 = vand.u32 4294901760, %v1268_v16  ;;  %v63_v22 = vand.u32 4294901760, %v1273_v17  ;;  %v1297_v24 = vld [vmem:[%s1561_s2 + $0x48] sm:$0xff]  ;;  %v1310_v30 = vld [vmem:[%s1561_s2 + $0x50] sm:$0xff]  ;;  %v1317_v32 = vsub.f32 %v23_v0, %v42_v3 }
   0x5   :  { %v1259_v13 = vpack.c.bf16 %v51_v8, %v48_v7  ;;  %v1283_v20 = vpack.c.bf16 %v57_v15, %v54_v14  ;;  %v1292_v23 = vld [vmem:[%s1561_s2 + $0x40] sm:$0xff]  ;;  %v21_v25 = vsub.f32 %v19_v18, %v20_v19  ;;  %v69_v29 = vand.u32 4294901760, %v1297_v24  ;;  %v1315_v31 = vld [vmem:[%s1561_s2 + $0x58] sm:$0xff]  ;;  %v1339_v39 = vld [vmem:[%s1561_s2 + $0x68] sm:$0xff] }
   0x6   :  { %1014 = vmatpush3.bf16.msra.mxu1 %v1255_v12  ;;  %1086 = vmatpush3.bf16.msra.mxu0 %v1255_v12  ;;  %v1301_v27 = vpack.c.bf16 %v63_v22, %v60_v21  ;;  %v66_v28 = vand.u32 4294901760, %v1292_v23  ;;  %v1321_v34 = vsub.f32 %v24_v1, %v45_v4  ;;  %v72_v36 = vand.u32 4294901760, %v1310_v30  ;;  %v1332_v38 = vld [vmem:[%s1561_s2 + $0x60] sm:$0xff]  ;;  %v1361_v46 = vld [vmem:[%s1561_s2 + $0x70] sm:$0xff]  ;;  %v1366_v47 = vld [vmem:[%s1561_s2 + $0x78] sm:$0xff] }
   0x7   :  { %1015 = vmatprep.subr.bf16.mxu1 %v1196_v2  ;;  %1087 = vmatprep.subr.bf16.mxu0 %v1196_v2  ;;  %v22_v26 = vmul.f32 %v21_v25, %v21_v25  ;;  %v75_v37 = vand.u32 4294901760, %v1315_v31  ;;  %v1341_v40 = vsub.f32 %v25_v5, %v48_v7  ;;  %v1343_v41 = vsub.f32 %v26_v6, %v51_v8 }
   0x8   :  { %v1325_v35 = vpack.c.bf16 %v69_v29, %v66_v28  ;;  %v78_v42 = vand.u32 4294901760, %v1332_v38  ;;  %v81_v45 = vand.u32 4294901760, %v1339_v39  ;;  %v135_v48 = vand.u32 4294901760, %v1317_v32 }
   0x9   :  { %v1319_v33 = vand.u32 4294901760, %v22_v26  ;;  %v1355_v44 = vpack.c.bf16 %v75_v37, %v72_v36  ;;  %v142_v49 = vand.u32 4294901760, %v1321_v34  ;;  %v1373_v50 = vsub.f32 %v1244_v9, %v54_v14 }
   0xa   :  { %1017 = vmatpush3.bf16.msra.mxu1 %v1259_v13  ;;  %1089 = vmatpush3.bf16.msra.mxu0 %v1259_v13  ;;  %v1376_v51 = vsub.f32 %v1249_v10, %v57_v15  ;;  %v84_v52 = vand.u32 4294901760, %v1361_v46  ;;  %v87_v53 = vand.u32 4294901760, %v1366_v47  ;;  %v149_v55 = vand.u32 4294901760, %v1341_v40 }
   0xb   :  { %1018 = vmatprep.subr.bf16.mxu1 %v1196_v2  ;;  %1090 = vmatprep.subr.bf16.mxu0 %v1196_v2  ;;  %v1347_v43 = vsub.f32 %v22_v26, %v1319_v33  ;;  %v1388_v56 = vpack.c.bf16 %v81_v45, %v78_v42  ;;  %v136_v57 = vsub.f32 %v1317_v32, %v135_v48  ;;  %v156_v59 = vand.u32 4294901760, %v1343_v41 }
   0xc   :  { %v143_v58 = vsub.f32 %v1321_v34, %v142_v49  ;;  %v1396_v60 = vsub.f32 %v1268_v16, %v60_v21  ;;  %v1399_v61 = vsub.f32 %v1273_v17, %v63_v22  ;;  %v150_v63 = vsub.f32 %v1341_v40, %v149_v55 }
   0xd   :  { %v124_v54 = vand.u32 4294901760, %v1347_v43  ;;  %v163_v0 = vand.u32 4294901760, %v1373_v50  ;;  %v170_v1 = vand.u32 4294901760, %v1376_v51  ;;  %v1411_v3 = vpack.c.bf16 %v87_v53, %v84_v52 }
   0xe   :  { %1020 = vmatpush3.bf16.msra.mxu1 %v1283_v20  ;;  %1092 = vmatpush3.bf16.msra.mxu0 %v1283_v20  ;;  %v137_v4 = vand.u32 4294901760, %v136_v57  ;;  %v144_v5 = vand.u32 4294901760, %v143_v58  ;;  %v157_v6 = vsub.f32 %v1343_v41, %v156_v59  ;;  %v1417_v7 = vsub.f32 %v1292_v23, %v66_v28 }
   0xf   :  { %1021 = vmatprep.subr.bf16.mxu1 %v1196_v2  ;;  %1093 = vmatprep.subr.bf16.mxu0 %v1196_v2  ;;  %v125_v62 = vsub.f32 %v1347_v43, %v124_v54  ;;  %v1420_v8 = vsub.f32 %v1297_v24, %v69_v29  ;;  %v1109_v9 = vpack.c.bf16 %v142_v49, %v135_v48  ;;  %v151_v14 = vand.u32 4294901760, %v150_v63 }
  0x10   :  { %v164_v15 = vsub.f32 %v1373_v50, %v163_v0  ;;  %v171_v16 = vsub.f32 %v1376_v51, %v170_v1  ;;  %v1037_v17 = vpack.c.bf16 %v144_v5, %v137_v4  ;;  %v158_v18 = vand.u32 4294901760, %v157_v6 }
  0x11   :  { %v126_v10 = vand.u32 4294901760, %v125_v62  ;;  %v177_v19 = vand.u32 4294901760, %v1396_v60  ;;  %v184_v21 = vand.u32 4294901760, %v1399_v61  ;;  %v1433_v22 = vsub.f32 %v1310_v30, %v72_v36 }
  0x12   :  { %1023 = vmatpush3.bf16.msra.mxu1 %v1301_v27  ;;  %1095 = vmatpush3.bf16.msra.mxu0 %v1301_v27  ;;  %v1438_v23 = vsub.f32 %v1315_v31, %v75_v37  ;;  %v1112_v24 = vpack.c.bf16 %v156_v59, %v149_v55  ;;  %v165_v25 = vand.u32 4294901760, %v164_v15  ;;  %v172_v26 = vand.u32 4294901760, %v171_v16 }
  0x13   :  { %1024 = vmatprep.subr.bf16.mxu1 %v1196_v2  ;;  %1096 = vmatprep.subr.bf16.mxu0 %v1196_v2  ;;  %v191_v28 = vand.u32 4294901760, %v1417_v7  ;;  %v198_v29 = vand.u32 4294901760, %v1420_v8  ;;  %v1040_v48 = vpack.c.bf16 %v158_v18, %v151_v14  ;;  %v178_v30 = vsub.f32 %v1396_v60, %v177_v19 }
  0x14   :  { %v185_v36 = vsub.f32 %v1399_v61, %v184_v21  ;;  %v1449_v31 = vsub.f32 %v1332_v38, %v78_v42  ;;  %v1454_v37 = vsub.f32 %v1339_v39, %v81_v45  ;;  %v1043_v49 = vpack.c.bf16 %v172_v26, %v165_v25 }
  0x15   :  { %v192_v55 = vsub.f32 %v1417_v7, %v191_v28  ;;  %v199_v57 = vsub.f32 %v1420_v8, %v198_v29  ;;  %v179_v38 = vand.u32 4294901760, %v178_v30  ;;  %v205_v58 = vand.u32 4294901760, %v1433_v22 }
  0x16   :  { %1026 = vmatpush3.bf16.msra.mxu1 %v1325_v35  ;;  %1098 = vmatpush3.bf16.msra.mxu0 %v1325_v35  ;;  %v186_v42 = vand.u32 4294901760, %v185_v36  ;;  %v212_v39 = vand.u32 4294901760, %v1438_v23  ;;  %v1469_v45 = vsub.f32 %v1361_v46, %v84_v52  ;;  %v1474_v59 = vsub.f32 %v1366_v47, %v87_v53 }
  0x17   :  { %1027 = vmatprep.subr.bf16.mxu1 %v1196_v2  ;;  %1099 = vmatprep.subr.bf16.mxu0 %v1196_v2  ;;  %v1118_v62 = vpack.c.bf16 %v184_v21, %v177_v19  ;;  %v193_v63 = vand.u32 4294901760, %v192_v55  ;;  %v226_v4 = vand.u32 4294901760, %v1454_v37  ;;  %v206_v6 = vsub.f32 %v1433_v22, %v205_v58 }
  0x18   :  { %v1046_v5 = vpack.c.bf16 %v186_v42, %v179_v38  ;;  %v213_v46 = vsub.f32 %v1438_v23, %v212_v39  ;;  %v1121_v52 = vpack.c.bf16 %v198_v29, %v191_v28  ;;  %v233_v15 = vand.u32 4294901760, %v1469_v45 }
  0x19   :  { %v240_v16 = vand.u32 4294901760, %v1474_v59 }
  0x1a   :  { %1029 = vmatpush3.bf16.msra.mxu1 %v1355_v44  ;;  %1101 = vmatpush3.bf16.msra.mxu0 %v1355_v44  ;;  %v214_v14 = vand.u32 4294901760, %v213_v46 }
  0x1b   :  { %1030 = vmatprep.subr.bf16.mxu1 %v1196_v2  ;;  %1102 = vmatprep.subr.bf16.mxu0 %v1196_v2  ;;  %v241_v25 = vsub.f32 %v1474_v59, %v240_v16  ;;  %v1130_v36 = vpack.c.bf16 %v240_v16, %v233_v15 }
  0x1e   :  { %1032 = vmatpush3.bf16.msra.mxu1 %v1388_v56  ;;  %1104 = vmatpush3.bf16.msra.mxu0 %v1388_v56 }
  0x1f   :  { %1033 = vmatprep.subr.bf16.mxu1 %v1196_v2  ;;  %1105 = vmatprep.subr.bf16.mxu0 %v1196_v2 }
  0x22   :  { %1035 = vmatpush3.bf16.msra.mxu1 %v1411_v3  ;;  %1107 = vmatpush3.bf16.msra.mxu0 %v1411_v3 }
  0x23   :  { %1036 = vmatprep.subr.bf16.mxu1 %v1196_v2  ;;  %1108 = vmatprep.subr.bf16.mxu0 %v1196_v2 }
  0x25   :  { %835 = vmatmul.mubr.f32.vlgmr.msra.gmra.mrb[0].mxu1 %v126_v10  ;;  %940 = vmatmul.mubr.f32.vlgmr.msra.gmra.mrb[0].mxu0 %v124_v54  ;;  %v1115_v54 = vpack.c.bf16 %v170_v1, %v163_v0  ;;  %v200_v0 = vand.u32 4294901760, %v199_v57  ;;  %v219_v1 = vand.u32 4294901760, %v1449_v31  ;;  %v207_v10 = vand.u32 4294901760, %v206_v6 }
  0x26   :  { %1038 = vmatpush3.bf16.msra.mxu1 %v1037_v17  ;;  %1110 = vmatpush3.bf16.msra.mxu0 %v1109_v9  ;;  %v227_v9 = vsub.f32 %v1454_v37, %v226_v4  ;;  %v1124_v17 = vpack.c.bf16 %v212_v39, %v205_v58 }
  0x27   :  { %1039 = vmatprep.subr.bf16.mxu1 %v1196_v2  ;;  %1111 = vmatprep.subr.bf16.mxu0 %v1196_v2  ;;  %v1049_v47 = vpack.c.bf16 %v200_v0, %v193_v63  ;;  %v220_v53 = vsub.f32 %v1449_v31, %v219_v1  ;;  %v1052_v19 = vpack.c.bf16 %v214_v14, %v207_v10 }
  0x28   :  { %869 = vmatprep.mubr.msk.f32.mxu1 %vm1197_vm0, %v1198_v11  ;;  %974 = vmatprep.mubr.msk.f32.mxu0 %vm1197_vm0, %v1198_v11  ;;  %v228_v21 = vand.u32 4294901760, %v227_v9  ;;  %v1127_v28 = vpack.c.bf16 %v226_v4, %v219_v1 }
  0x29   :  { %v221_v18 = vand.u32 4294901760, %v220_v53 }
  0x2a   :  { %1041 = vmatpush3.bf16.msra.mxu1 %v1040_v48  ;;  %1113 = vmatpush3.bf16.msra.mxu0 %v1112_v24  ;;  %v234_v24 = vsub.f32 %v1469_v45, %v233_v15  ;;  %v242_v48 = vand.u32 4294901760, %v241_v25 }
  0x2b   :  { %1042 = vmatprep.subr.bf16.mxu1 %v1196_v2  ;;  %1114 = vmatprep.subr.bf16.mxu0 %v1196_v2  ;;  %v1055_v26 = vpack.c.bf16 %v228_v21, %v221_v18 }
  0x2c   :  { %v235_v29 = vand.u32 4294901760, %v234_v24 }
  0x2e   :  { %1044 = vmatpush3.bf16.msra.mxu1 %v1043_v49  ;;  %1116 = vmatpush3.bf16.msra.mxu0 %v1115_v54  ;;  %v1058_v30 = vpack.c.bf16 %v242_v48, %v235_v29  ;;  %v1061_v49 = vpack.c.bf16 %v1321_v34, %v1317_v32  ;;  %v1064_v54 = vpack.c.bf16 %v1343_v41, %v1341_v40  ;;  %v40_v34 = vstv %s1562_s3 }
  0x2f   :  { %1045 = vmatprep.subr.bf16.mxu1 %v1196_v2  ;;  %1117 = vmatprep.subr.bf16.mxu0 %v1196_v2  ;;  %v1067_v32 = vpack.c.bf16 %v1376_v51, %v1373_v50 }
  0x32   :  { %1047 = vmatpush3.bf16.msra.mxu1 %v1046_v5  ;;  %1119 = vmatpush3.bf16.msra.mxu0 %v1118_v62 }
  0x33   :  { %1048 = vmatprep.subr.bf16.mxu1 %v1196_v2  ;;  %1120 = vmatprep.subr.bf16.mxu0 %v1196_v2 }
  0x36   :  { %1050 = vmatpush3.bf16.msra.mxu1 %v1049_v47  ;;  %1122 = vmatpush3.bf16.msra.mxu0 %v1121_v52 }
  0x37   :  { %1051 = vmatprep.subr.bf16.mxu1 %v1196_v2  ;;  %1123 = vmatprep.subr.bf16.mxu0 %v1196_v2 }
  0x3a   :  { %1053 = vmatpush3.bf16.msra.mxu1 %v1052_v19  ;;  %1125 = vmatpush3.bf16.msra.mxu0 %v1124_v17 }
  0x3b   :  { %1054 = vmatprep.subr.bf16.mxu1 %v1196_v2  ;;  %1126 = vmatprep.subr.bf16.mxu0 %v1196_v2 }
  0x3e   :  { %1056 = vmatpush3.bf16.msra.mxu1 %v1055_v26  ;;  %1128 = vmatpush3.bf16.msra.mxu0 %v1127_v28 }
  0x3f   :  { %1057 = vmatprep.subr.bf16.mxu1 %v1196_v2  ;;  %1129 = vmatprep.subr.bf16.mxu0 %v1196_v2 }
  0x42   :  { %1059 = vmatpush3.bf16.msra.mxu1 %v1058_v30  ;;  %1131 = vmatpush3.bf16.msra.mxu0 %v1130_v36 }
  0x43   :  { %1060 = vmatprep.subr.bf16.mxu1 %v1196_v2  ;;  %1132 = vmatprep.subr.bf16.mxu0 %v1196_v2 }
  0x45   :  { %870 = vmatmul.mubr.f32.vlgmr.msra.gmra.mrb[0].mxu1 %v1319_v33  ;;  %975 = vmatmul.mubr.f32.vlgmr.msra.gmra.mrb[0].mxu0 %v1319_v33 }
  0x46   :  { %1062 = vmatpush3.bf16.msra.mxu1 %v1061_v49  ;;  %1134 = vmatpush3.bf16.msra.mxu0 %v1255_v12  ;;  %v1070_v12 = vpack.c.bf16 %v1399_v61, %v1396_v60 }
  0x47   :  { %1063 = vmatprep.subr.bf16.mxu1 %v1196_v2  ;;  %1135 = vmatprep.subr.bf16.mxu0 %v1196_v2 }
  0x48   :  { %904 = vmatprep.mubr.msk.f32.mxu1 %vm1197_vm0, %v1198_v11  ;;  %1009 = vmatprep.mubr.msk.f32.mxu0 %vm1197_vm0, %v1198_v11  ;;  %v1073_v11 = vpack.c.bf16 %v1420_v8, %v1417_v7 }
  0x4a   :  { %1065 = vmatpush3.bf16.msra.mxu1 %v1064_v54  ;;  %1137 = vmatpush3.bf16.msra.mxu0 %v1259_v13  ;;  %v1076_v13 = vpack.c.bf16 %v1438_v23, %v1433_v22 }
  0x4b   :  { %1066 = vmatprep.subr.bf16.mxu1 %v1196_v2  ;;  %1138 = vmatprep.subr.bf16.mxu0 %v1196_v2 }
  0x4e   :  { %1068 = vmatpush3.bf16.msra.mxu1 %v1067_v32  ;;  %1140 = vmatpush3.bf16.msra.mxu0 %v1283_v20  ;;  %v1079_v20 = vpack.c.bf16 %v1454_v37, %v1449_v31 }
  0x4f   :  { %1069 = vmatprep.subr.bf16.mxu1 %v1196_v2  ;;  %1141 = vmatprep.subr.bf16.mxu0 %v1196_v2 }
  0x52   :  { %1071 = vmatpush3.bf16.msra.mxu1 %v1070_v12  ;;  %1143 = vmatpush3.bf16.msra.mxu0 %v1301_v27  ;;  %v1082_v27 = vpack.c.bf16 %v1474_v59, %v1469_v45 }
  0x53   :  { %1072 = vmatprep.subr.bf16.mxu1 %v1196_v2  ;;  %1144 = vmatprep.subr.bf16.mxu0 %v1196_v2 }
  0x56   :  { %1074 = vmatpush3.bf16.msra.mxu1 %v1073_v11  ;;  %1146 = vmatpush3.bf16.msra.mxu0 %v1325_v35 }
  0x57   :  { %1075 = vmatprep.subr.bf16.mxu1 %v1196_v2  ;;  %1147 = vmatprep.subr.bf16.mxu0 %v1196_v2 }
  0x5a   :  { %1077 = vmatpush3.bf16.msra.mxu1 %v1076_v13  ;;  %1149 = vmatpush3.bf16.msra.mxu0 %v1355_v44 }
  0x5b   :  { %1078 = vmatprep.subr.bf16.mxu1 %v1196_v2  ;;  %1150 = vmatprep.subr.bf16.mxu0 %v1196_v2 }
  0x5e   :  { %1080 = vmatpush3.bf16.msra.mxu1 %v1079_v20  ;;  %1152 = vmatpush3.bf16.msra.mxu0 %v1388_v56 }
  0x5f   :  { %1081 = vmatprep.subr.bf16.mxu1 %v1196_v2  ;;  %1153 = vmatprep.subr.bf16.mxu0 %v1196_v2 }
  0x62   :  { %1083 = vmatpush3.bf16.msra.mxu1 %v1082_v27  ;;  %1155 = vmatpush3.bf16.msra.mxu0 %v1411_v3 }
  0x65   :  { %905 = vmatmul.mubr.f32.vlgmr.msra.gmra.mrb[0].mxu1 %v1347_v43  ;;  %1010 = vmatmul.mubr.f32.vlgmr.msra.gmra.mrb[0].mxu0 %v1319_v33 }
 0x138   :  { %v383_v35 = vpop.f32.mrb[0].mxu1  ;;  %v678_v40 = vpop.f32.mrb[0].mxu0 }
 0x139   :  { %v1156_v41 = vadd.f32 %v383_v35, %v40_v34  ;;  %v906_v44 = vpop.f32.mrb[1].mxu1  ;;  %v1011_v50 = vpop.f32.mrb[1].mxu0 }
 0x13b   :  { %v1157_v51 = vadd.f32 %v1156_v41, %v678_v40 }
 0x13d   :  { %683 = vst.msk [vmem:[#allocation3] sm:$0xff] %vm682_vm1, %v1157_v51 }
 0x13e   :  { %688 = vsyncadd [#allocation4], 64  ;;  %s1199_s24 = smov [#allocation3]  }
 0x13f   :  { %s689_s25 = sshll.u32 %s1199_s24, 4  ;;  %s690_s25 = int_to_ptr.vmem [resolvable:$true] %s689_s25 }
 0x140   :  { %s1172_s26 = scalar_lea.vmem %s690_s25, 64  ;;  %s1176_s27 = scalar_lea.vmem %s690_s25, 128 }
 0x141   :  { %p1173_p0 = scmp.ne.s32.totalorder %s690_s25, %s1172_s26  ;;  %p1177_p1 = scmp.lt.s32.totalorder %s690_s25, %s690_s25 }
 0x142   :  { %p1178_p2 = scmp.lt.s32.totalorder %s1176_s27, %s1172_s26 }
 0x144   :  { %p1179_p3 = por %p1178_p2, %p1177_p1 }
 0x146   :  { %p1180_p4 = pnand %p1179_p3, %p1173_p0 }
 0x148   :  { %1183 = shalt.err (!%p1180_p4)
}
 0x149   :  { %s1184_s29 = scalar_lea.hbm %s1563_s4, 64 }
 0x14a   :  { %p1185_p5 = scmp.ne.s32.totalorder %s1563_s4, %s1184_s29  ;;  %p1188_p6 = scmp.lt.u32.totalorder %s1184_s29, %s1563_s4 }
 0x14c   :  { %p1190_p7 = pnand %p1188_p6, %p1185_p5 }
 0x14e   :  { %1193 = shalt.err (!%p1190_p7)
}
 0x14f   :  { %s1200_s8 = smov 64   ;;  %s1201_s9 = smov 4  }
 0x150   :  { %695 = dma.vmem_to_hbm [thread:$0]  %s690_s25, 64, %s1563_s4, [#allocation4], %s1200_s8, %s1200_s8, %s1201_s9  }
 0x151   :  { %1194 = dma.done.wait [#allocation4], 128  }
 0x152   :  { %1195 = vsyncadd [#allocation4], 4294967168 }
 0x153   :  { %699 = vsyncpa [#allocation4], 1 }

</bundles_post_ra>
